<compile_context>
chip_gen: v5e
topology: v5e:2x2
jax: 0.10.0
libtpu: 0.0.40
codegen_flags: <defaults>
</compile_context>

<pallas_src>
from functools import partial

import jax
import jax.numpy as jnp
from jax.experimental import pallas as pl
from jax.experimental.pallas import tpu as pltpu


def encoder_kernel(x_ref, w1_ref, b1_ref, w2_ref, b2_ref,
                   wh_ref, bh_ref, eps_ref, out_ref):
    x = x_ref[...]

    # fc1: Linear -> Tanh -> Linear -> Tanh  (tanh goes to the EUP slot).
    h = jnp.tanh(
        jnp.dot(x, w1_ref[...], preferred_element_type=jnp.float32) + b1_ref[...]
    )
    h = jnp.tanh(
        jnp.dot(h, w2_ref[...], preferred_element_type=jnp.float32) + b2_ref[...]
    )

    # Fused heads: one matmul produces [mu | logvar] along lanes.
    heads = jnp.dot(h, wh_ref[...], preferred_element_type=jnp.float32) + bh_ref[...]
    z_dim = eps_ref.shape[-1]
    mu = heads[:, :z_dim]
    logvar = heads[:, z_dim:]

    # Reparameterization: z = mu + eps * exp(logvar / 2).
    z = mu + eps_ref[...] * jnp.exp(logvar * 0.5)

    # Packed lane-dense output block: [mu | logvar | z | zero pad].
    # Direct sub-slice stores (no lane-axis concatenate).
    out_ref[:, : 2 * z_dim] = heads
    out_ref[:, 2 * z_dim : 3 * z_dim] = z
    pad = out_ref.shape[-1] - 3 * z_dim
    if pad:
        out_ref[:, 3 * z_dim :] = jnp.zeros((x.shape[0], pad), out_ref.dtype)


def _const_spec(shape):
    """Weights/biases: constant block index across the batch grid."""
    index_map = lambda i: (0, 0)
    try:
        # Single-buffer: the block never changes, so double-buffering only
        # wastes VMEM (matters once h_dim scales, esp. on v7x's 64 MiB VMEM).
        return pl.BlockSpec(shape, index_map, pipeline_mode=pl.Buffered(buffer_count=1))
    except (TypeError, AttributeError):
        # Older jax without pipeline_mode support: fall back to default.
        return pl.BlockSpec(shape, index_map)


def _choose_batch_tiling(B, batch_tile):
    """Pick (tile_rows, n_tiles, padded_batch) for the 1-D batch grid."""
    b8 = ((B + 7) // 8) * 8                       # sublane multiple
    min_tiles = 2 if b8 >= 16 else 1              # feed both TCs on v7x
    n_tiles = max(min_tiles, pl.cdiv(b8, batch_tile))
    if n_tiles > 1 and n_tiles % 2:
        n_tiles += 1                              # even count -> no straggler TC
    bt = ((pl.cdiv(b8, n_tiles) + 7) // 8) * 8    # sublane-aligned tile rows
    return bt, n_tiles, n_tiles * bt


@partial(jax.jit, static_argnames=("batch_tile",))
def encoder_forward(x, params, eps, *, batch_tile=1024):
    """x: (B, x_dim) f32; eps: (B, z_dim) f32. Returns (z, mu, logvar)."""
    B, x_dim = x.shape
    h_dim = params["w1"].shape[1]
    z_dim = params["w_head"].shape[1] // 2

    bt, n_tiles, Bp = _choose_batch_tiling(B, batch_tile)
    if Bp != B:
        x = jnp.pad(x, ((0, Bp - B), (0, 0)))
        eps = jnp.pad(eps, ((0, Bp - B), (0, 0)))

    # Output slab padded to a lane-dense (multiple of 128) width.
    out_lanes = ((3 * z_dim + 127) // 128) * 128

    in_specs = [
        pl.BlockSpec((bt, x_dim), lambda i: (i, 0)),              # x
        _const_spec((x_dim, h_dim)), _const_spec((1, h_dim)),     # w1, b1
        _const_spec((h_dim, h_dim)), _const_spec((1, h_dim)),     # w2, b2
        _const_spec((h_dim, 2 * z_dim)), _const_spec((1, 2 * z_dim)),  # head w, b
        pl.BlockSpec((bt, z_dim), lambda i: (i, 0)),              # eps
    ]
    out_spec = pl.BlockSpec((bt, out_lanes), lambda i: (i, 0))

    # Advisory cost hint for XLA's scheduler (tiny, mem-bound call).
    flops = 2 * Bp * (x_dim * h_dim + h_dim * h_dim + h_dim * 2 * z_dim)
    transcendentals = Bp * (2 * h_dim + z_dim)                    # 2x tanh + exp
    weight_bytes = 4 * (x_dim * h_dim + h_dim * h_dim + h_dim * 2 * z_dim
                        + 2 * h_dim + 2 * z_dim)
    bytes_accessed = 4 * Bp * (x_dim + z_dim + out_lanes) + weight_bytes

    out = pl.pallas_call(
        encoder_kernel,
        out_shape=jax.ShapeDtypeStruct((Bp, out_lanes), jnp.float32),
        grid=(n_tiles,),
        in_specs=in_specs,
        out_specs=out_spec,
        compiler_params=pltpu.CompilerParams(
            dimension_semantics=("parallel",)),
        cost_estimate=pl.CostEstimate(
            flops=flops, transcendentals=transcendentals,
            bytes_accessed=bytes_accessed),
    )(x, params["w1"], params["b1"], params["w2"], params["b2"],
      params["w_head"], params["b_head"], eps)

    mu = out[:B, 0:z_dim]
    logvar = out[:B, z_dim:2 * z_dim]
    z = out[:B, 2 * z_dim:3 * z_dim]
    return z, mu, logvar


def init_params(key, x_dim, h_dim, z_dim):
    """Deterministic init mimicking nn.Linear's U(-1/sqrt(fan_in), 1/sqrt(fan_in))."""
    ks = jax.random.split(key, 8)

    def lin(kw, kb, fan_in, fan_out):
        bound = 1.0 / jnp.sqrt(jnp.float32(fan_in))
        w = jax.random.uniform(kw, (fan_in, fan_out), jnp.float32, -bound, bound)
        b = jax.random.uniform(kb, (1, fan_out), jnp.float32, -bound, bound)
        return w, b

    w1, b1 = lin(ks[0], ks[1], x_dim, h_dim)
    w2, b2 = lin(ks[2], ks[3], h_dim, h_dim)
    wmu, bmu = lin(ks[4], ks[5], h_dim, z_dim)
    wlv, blv = lin(ks[6], ks[7], h_dim, z_dim)
    # Head fusion done ONCE here (hoisted out of the per-call path):
    # a single (h_dim, 2*z_dim) weight producing [mu | logvar].
    w_head = jnp.concatenate([wmu, wlv], axis=1)
    b_head = jnp.concatenate([bmu, blv], axis=1)
    return dict(w1=w1, b1=b1, w2=w2, b2=b2,
                wmu=wmu, bmu=bmu, wlv=wlv, blv=blv,
                w_head=w_head, b_head=b_head)


def encoder_ref(x, params, eps):
    """Pure-JAX reference for correctness check."""
    h = jnp.tanh(x @ params["w1"] + params["b1"])
    h = jnp.tanh(h @ params["w2"] + params["b2"])
    mu = h @ params["wmu"] + params["bmu"]
    logvar = h @ params["wlv"] + params["blv"]
    z = mu + eps * jnp.exp(logvar * 0.5)
    return z, mu, logvar


if __name__ == "__main__":
    B, x_dim, h_dim, z_dim = 8, 32, 32, 16

    key = jax.random.PRNGKey(0)
    k_x, k_eps, k_p = jax.random.split(key, 3)

    x = jax.random.normal(k_x, (B, x_dim), dtype=jnp.float32)
    # TODO(synk): torch.randn_like is drawn host-side with jax.random (deterministic).
    eps = jax.random.normal(k_eps, (B, z_dim), dtype=jnp.float32)
    params = init_params(k_p, x_dim, h_dim, z_dim)

    z, mu, logvar = encoder_forward(x, params, eps)
    jax.block_until_ready((z, mu, logvar))

    z_r, mu_r, lv_r = encoder_ref(x, params, eps)
    assert jnp.allclose(z, z_r, atol=1e-5, rtol=1e-5)
    assert jnp.allclose(mu, mu_r, atol=1e-5, rtol=1e-5)
    assert jnp.allclose(logvar, lv_r, atol=1e-5, rtol=1e-5)

    print("KERNEL_OK")
</pallas_src>

<mosaic_0001>
module attributes {stable_mosaic.version = 11 : i64} {
  func.func @encoder_kernel(%arg0: i32, %arg1: memref<8x32xf32, #tpu.memory_space<vmem>>, %arg2: memref<32x32xf32, #tpu.memory_space<vmem>>, %arg3: memref<1x32xf32, #tpu.memory_space<vmem>>, %arg4: memref<32x32xf32, #tpu.memory_space<vmem>>, %arg5: memref<1x32xf32, #tpu.memory_space<vmem>>, %arg6: memref<32x32xf32, #tpu.memory_space<vmem>>, %arg7: memref<1x32xf32, #tpu.memory_space<vmem>>, %arg8: memref<8x16xf32, #tpu.memory_space<vmem>>, %arg9: memref<8x128xf32, #tpu.memory_space<vmem>>) attributes {dimension_semantics = [#tpu.dimension_semantics<parallel>], iteration_bounds = array<i64: 1>, scalar_prefetch = 0 : i64, scratch_operands = 0 : i64, tpu.core_type = #tpu.core_type<tc>, window_params = [{transform_indices = @transform_0, window_bounds = array<i64: 8, 32>}, {pipeline_mode = #tpu.pipeline_mode<synchronous>, transform_indices = @transform_1, window_bounds = array<i64: 32, 32>}, {pipeline_mode = #tpu.pipeline_mode<synchronous>, transform_indices = @transform_2, window_bounds = array<i64: 1, 32>}, {pipeline_mode = #tpu.pipeline_mode<synchronous>, transform_indices = @transform_3, window_bounds = array<i64: 32, 32>}, {pipeline_mode = #tpu.pipeline_mode<synchronous>, transform_indices = @transform_4, window_bounds = array<i64: 1, 32>}, {pipeline_mode = #tpu.pipeline_mode<synchronous>, transform_indices = @transform_5, window_bounds = array<i64: 32, 32>}, {pipeline_mode = #tpu.pipeline_mode<synchronous>, transform_indices = @transform_6, window_bounds = array<i64: 1, 32>}, {transform_indices = @transform_7, window_bounds = array<i64: 8, 16>}, {transform_indices = @transform_8, window_bounds = array<i64: 8, 128>}]} {
    %c0 = arith.constant 0 : index
    %c0_0 = arith.constant 0 : index
    %0 = vector.load %arg1[%c0, %c0_0] : memref<8x32xf32, #tpu.memory_space<vmem>>, vector<8x32xf32>
    %c0_1 = arith.constant 0 : index
    %c0_2 = arith.constant 0 : index
    %1 = vector.load %arg2[%c0_1, %c0_2] : memref<32x32xf32, #tpu.memory_space<vmem>>, vector<32x32xf32>
    %cst = arith.constant dense<0.000000e+00> : vector<8x32xf32>
    %2 = tpu.matmul %0, %1, %cst {dimension_numbers = #tpu.dot_dimension_numbers<[1], [0], [0], [1], [0, 0, 1, 1], [], []>} : vector<8x32xf32>, vector<32x32xf32>, vector<8x32xf32> -> vector<8x32xf32>
    %c0_3 = arith.constant 0 : index
    %c0_4 = arith.constant 0 : index
    %3 = vector.load %arg3[%c0_3, %c0_4] : memref<1x32xf32, #tpu.memory_space<vmem>>, vector<1x32xf32>
    %4 = vector.broadcast %3 : vector<1x32xf32> to vector<8x32xf32>
    %5 = arith.addf %2, %4 : vector<8x32xf32>
    %6 = math.tanh %5 : vector<8x32xf32>
    %c0_5 = arith.constant 0 : index
    %c0_6 = arith.constant 0 : index
    %7 = vector.load %arg4[%c0_5, %c0_6] : memref<32x32xf32, #tpu.memory_space<vmem>>, vector<32x32xf32>
    %cst_7 = arith.constant dense<0.000000e+00> : vector<8x32xf32>
    %8 = tpu.matmul %6, %7, %cst_7 {dimension_numbers = #tpu.dot_dimension_numbers<[1], [0], [0], [1], [0, 0, 1, 1], [], []>} : vector<8x32xf32>, vector<32x32xf32>, vector<8x32xf32> -> vector<8x32xf32>
    %c0_8 = arith.constant 0 : index
    %c0_9 = arith.constant 0 : index
    %9 = vector.load %arg5[%c0_8, %c0_9] : memref<1x32xf32, #tpu.memory_space<vmem>>, vector<1x32xf32>
    %10 = vector.broadcast %9 : vector<1x32xf32> to vector<8x32xf32>
    %11 = arith.addf %8, %10 : vector<8x32xf32>
    %12 = math.tanh %11 : vector<8x32xf32>
    %c0_10 = arith.constant 0 : index
    %c0_11 = arith.constant 0 : index
    %13 = vector.load %arg6[%c0_10, %c0_11] : memref<32x32xf32, #tpu.memory_space<vmem>>, vector<32x32xf32>
    %cst_12 = arith.constant dense<0.000000e+00> : vector<8x32xf32>
    %14 = tpu.matmul %12, %13, %cst_12 {dimension_numbers = #tpu.dot_dimension_numbers<[1], [0], [0], [1], [0, 0, 1, 1], [], []>} : vector<8x32xf32>, vector<32x32xf32>, vector<8x32xf32> -> vector<8x32xf32>
    %c0_13 = arith.constant 0 : index
    %c0_14 = arith.constant 0 : index
    %15 = vector.load %arg7[%c0_13, %c0_14] : memref<1x32xf32, #tpu.memory_space<vmem>>, vector<1x32xf32>
    %16 = vector.broadcast %15 : vector<1x32xf32> to vector<8x32xf32>
    %17 = arith.addf %14, %16 : vector<8x32xf32>
    %18 = vector.extract_strided_slice %17 {offsets = [0, 0], sizes = [8, 16], strides = [1, 1]} : vector<8x32xf32> to vector<8x16xf32>
    %19 = vector.extract_strided_slice %17 {offsets = [0, 16], sizes = [8, 16], strides = [1, 1]} : vector<8x32xf32> to vector<8x16xf32>
    %c0_15 = arith.constant 0 : index
    %c0_16 = arith.constant 0 : index
    %20 = vector.load %arg8[%c0_15, %c0_16] : memref<8x16xf32, #tpu.memory_space<vmem>>, vector<8x16xf32>
    %cst_17 = arith.constant 5.000000e-01 : f32
    %21 = vector.broadcast %cst_17 : f32 to vector<8x16xf32>
    %22 = arith.mulf %19, %21 : vector<8x16xf32>
    %23 = math.exp %22 : vector<8x16xf32>
    %24 = arith.mulf %20, %23 : vector<8x16xf32>
    %25 = arith.addf %18, %24 : vector<8x16xf32>
    %c0_18 = arith.constant 0 : index
    %c0_19 = arith.constant 0 : index
    %26 = vector.load %arg9[%c0_18, %c0_19] : memref<8x128xf32, #tpu.memory_space<vmem>>, vector<8x32xf32>
    tpu.vector_store %arg9[%c0_18, %c0_19], %17 {strides = array<i32>} : memref<8x128xf32, #tpu.memory_space<vmem>>, vector<8x32xf32>,
    %c0_20 = arith.constant 0 : index
    %c32 = arith.constant 32 : index
    %27 = vector.load %arg9[%c0_20, %c32] : memref<8x128xf32, #tpu.memory_space<vmem>>, vector<8x16xf32>
    tpu.vector_store %arg9[%c0_20, %c32], %25 {strides = array<i32>} : memref<8x128xf32, #tpu.memory_space<vmem>>, vector<8x16xf32>,
    %cst_21 = arith.constant 0.000000e+00 : f32
    %28 = vector.broadcast %cst_21 : f32 to vector<8x80xf32>
    %c0_22 = arith.constant 0 : index
    %c48 = arith.constant 48 : index
    %29 = vector.load %arg9[%c0_22, %c48] : memref<8x128xf32, #tpu.memory_space<vmem>>, vector<8x80xf32>
    tpu.vector_store %arg9[%c0_22, %c48], %28 {strides = array<i32>} : memref<8x128xf32, #tpu.memory_space<vmem>>, vector<8x80xf32>,
    return
  }
  func.func @transform_0(%arg0: i32) -> (i32, i32) {
    %c0_i32 = arith.constant 0 : i32
    %c0_i32_0 = arith.constant 0 : i32
    return %arg0, %c0_i32 : i32, i32
  }
  func.func @transform_1(%arg0: i32) -> (i32, i32) {
    %c0_i32 = arith.constant 0 : i32
    %c0_i32_0 = arith.constant 0 : i32
    %c0_i32_1 = arith.constant 0 : i32
    return %c0_i32, %c0_i32_0 : i32, i32
  }
  func.func @transform_2(%arg0: i32) -> (i32, i32) {
    %c0_i32 = arith.constant 0 : i32
    %c0_i32_0 = arith.constant 0 : i32
    %c0_i32_1 = arith.constant 0 : i32
    return %c0_i32, %c0_i32_0 : i32, i32
  }
  func.func @transform_3(%arg0: i32) -> (i32, i32) {
    %c0_i32 = arith.constant 0 : i32
    %c0_i32_0 = arith.constant 0 : i32
    %c0_i32_1 = arith.constant 0 : i32
    return %c0_i32, %c0_i32_0 : i32, i32
  }
  func.func @transform_4(%arg0: i32) -> (i32, i32) {
    %c0_i32 = arith.constant 0 : i32
    %c0_i32_0 = arith.constant 0 : i32
    %c0_i32_1 = arith.constant 0 : i32
    return %c0_i32, %c0_i32_0 : i32, i32
  }
  func.func @transform_5(%arg0: i32) -> (i32, i32) {
    %c0_i32 = arith.constant 0 : i32
    %c0_i32_0 = arith.constant 0 : i32
    %c0_i32_1 = arith.constant 0 : i32
    return %c0_i32, %c0_i32_0 : i32, i32
  }
  func.func @transform_6(%arg0: i32) -> (i32, i32) {
    %c0_i32 = arith.constant 0 : i32
    %c0_i32_0 = arith.constant 0 : i32
    %c0_i32_1 = arith.constant 0 : i32
    return %c0_i32, %c0_i32_0 : i32, i32
  }
  func.func @transform_7(%arg0: i32) -> (i32, i32) {
    %c0_i32 = arith.constant 0 : i32
    %c0_i32_0 = arith.constant 0 : i32
    return %arg0, %c0_i32 : i32, i32
  }
  func.func @transform_8(%arg0: i32) -> (i32, i32) {
    %c0_i32 = arith.constant 0 : i32
    %c0_i32_0 = arith.constant 0 : i32
    return %arg0, %c0_i32 : i32, i32
  }
}

</mosaic_0001>

<bundles_post_ra>
// kernel: encoder_forward.1
= control target key start
LH: loop header
LB: loop body
LE: loop exit
PB: predicated region body
PF: predicated region fallthrough
CT: control target
= control target key end

     0   :  { %13 = vsyncpa [#allocation3], 0  ;;  %s518_s0 = inlined_call_operand.hbm [shape: f32[8,32], index: 0, kind: input, shape index: {}]   ;;  %s519_s1 = inlined_call_operand.hbm [shape: f32[32,32], index: 1, kind: input, shape index: {}]   ;;  %s520_s2 = inlined_call_operand.hbm [shape: f32[1,32], index: 2, kind: input, shape index: {}]   ;;  %s521_s3 = inlined_call_operand.hbm [shape: f32[32,32], index: 3, kind: input, shape index: {}]   ;;  %s522_s4 = inlined_call_operand.vmem [shape: f32[1,32], index: 4, kind: input, shape index: {}]   ;;  %s523_s5 = inlined_call_operand.hbm [shape: f32[32,32], index: 5, kind: input, shape index: {}]   ;;  %s524_s6 = inlined_call_operand.vmem [shape: f32[1,32], index: 6, kind: input, shape index: {}]   ;;  %s525_s7 = inlined_call_operand.hbm [shape: f32[8,16], index: 7, kind: input, shape index: {}]   ;;  %s526_s8 = inlined_call_operand.vmem [shape: f32[8,128], index: 8, kind: output, shape index: {}]  }
   0x1   :  { %14 = vsyncpa [#allocation5], 0 }
   0x2   :  { %15 = vsyncpa [#allocation8], 0  ;;  %s32_s29 = sshll.u32 %s519_s1, 4  ;;  %s33_s29 = int_to_ptr.hbm [resolvable:$true] %s32_s29 }
   0x3   :  { %16 = vsyncpa [#allocation11], 0  ;;  %s416_s30 = smov [#allocation4]   ;;  %s56_s12 = sshll.u32 %s521_s3, 4  ;;  %s57_s12 = int_to_ptr.hbm [resolvable:$true] %s56_s12 }
   0x4   :  { %s34_s9 = sshll.u32 %s416_s30, 4  ;;  %s417_s13 = smov 128   ;;  %s35_s9 = int_to_ptr.vmem [resolvable:$true] %s34_s9 }
   0x5   :  { %s418_s14 = smov 8   ;;  %s419_s15 = smov [#allocation7]  }
   0x6   :  { %40 = dma.hbm_to_vmem [thread:$0]  %s33_s29, 512, %s35_s9, [#allocation5], %s417_s13, %s417_s13, %s418_s14  }
   0x7   :  { %s58_s16 = sshll.u32 %s419_s15, 4  ;;  %s22_s18 = sshll.u32 %s518_s0, 4  ;;  %s59_s16 = int_to_ptr.vmem [resolvable:$true] %s58_s16  ;;  %s23_s18 = int_to_ptr.hbm [resolvable:$true] %s22_s18 }
   0x8   :  { %64 = dma.hbm_to_vmem [thread:$0]  %s57_s12, 512, %s59_s16, [#allocation8], %s417_s13, %s417_s13, %s418_s14  }
   0x9   :  { %s46_s20 = sshll.u32 %s520_s2, 4  ;;  %s420_s21 = smov [#allocation2]   ;;  %s47_s20 = int_to_ptr.hbm [resolvable:$true] %s46_s20 }
   0xa   :  { %s24_s22 = sshll.u32 %s420_s21, 4  ;;  %s421_s23 = smov [#allocation6]   ;;  %s25_s22 = int_to_ptr.vmem [resolvable:$true] %s24_s22 }
   0xb   :  { %27 = dma.hbm_to_vmem [thread:$0]  %s23_s18, 128, %s25_s22, [#allocation3]  }
   0xc   :  { %s48_s24 = sshll.u32 %s421_s23, 4  ;;  %s71_s0 = sshll.u32 %s523_s5, 4  ;;  %s49_s24 = int_to_ptr.vmem [resolvable:$true] %s48_s24  ;;  %s72_s0 = int_to_ptr.hbm [resolvable:$true] %s71_s0 }
   0xd   :  { %51 = dma.hbm_to_vmem [thread:$0]  %s47_s20, 16, %s49_s24, [#allocation5]  }
   0xe   :  { %s87_s29 = sshll.u32 %s525_s7, 4  ;;  %s422_s30 = smov [#allocation9]   ;;  %s88_s29 = int_to_ptr.hbm [resolvable:$true] %s87_s29 }
   0xf   :  { %s73_s2 = sshll.u32 %s422_s30, 4  ;;  %s423_s9 = smov [#allocation10]   ;;  %s74_s2 = int_to_ptr.vmem [resolvable:$true] %s73_s2 }
  0x10   :  { %79 = dma.hbm_to_vmem [thread:$0]  %s72_s0, 512, %s74_s2, [#allocation8], %s417_s13, %s417_s13, %s418_s14  }
  0x11   :  { %s89_s10 = sshll.u32 %s423_s9, 4  ;;  %s90_s10 = int_to_ptr.vmem [resolvable:$true] %s89_s10 }
  0x12   :  { %92 = dma.hbm_to_vmem [thread:$0]  %s88_s29, 128, %s90_s10, [#allocation11]  }
  0x13   :  { %408 = dma.done.wait [#allocation3], 128  }
  0x14   :  { %409 = vsyncadd [#allocation3], 4294967168 }
  0x15   :  { %410 = dma.done.wait [#allocation5], 528  }
  0x16   :  { %411 = vsyncadd [#allocation5], 4294966768 }
  0x17   :  { %412 = dma.done.wait [#allocation8], 1024  }
  0x18   :  { %413 = vsyncadd [#allocation8], 4294966272 }
  0x19   :  { %414 = dma.done.wait [#allocation11], 128  }
  0x1a   :  { %415 = vsyncadd [#allocation11], 4294967168  ;;  %v121_v0 = vld [vmem:[#allocation4 + $0x18] sm:$0xff]  ;;  %v120_v1 = vld [vmem:[#allocation4 + $0x10] sm:$0xff]  ;;  %vm126_vm0 = vcmask 261120   ;;  %s425_s15 = smov 32  }
  0x1b   :  { %142 = vmatpush.msra.mxu0 %v121_v0  ;;  %v119_v2 = vld [vmem:[#allocation4 + $0x8] sm:$0xff]  ;;  %v118_v3 = vld [vmem:[#allocation4] sm:$0xff]  ;;  %v117_v4 = vld [vmem:[#allocation2] sm:$0xff]  ;;  %vm229_vm1 = vcmask 392448   ;;  %vm231_vm2 = vcmask 1047936   ;;  %v426_v32 = vmov 0.0  }
  0x1c   :  { %v154_v5 = vld [vmem:[#allocation7 + $0x18] sm:$0xff]  ;;  %v153_v6 = vld [vmem:[#allocation7 + $0x10] sm:$0xff]  ;;  %v152_v7 = vld [vmem:[#allocation7 + $0x8] sm:$0xff] }
  0x1d   :  { %143 = vmatpush.msra.mxu0 %v120_v1  ;;  %174 = vmatpush.msra.mxu1 %v154_v5  ;;  %v151_v8 = vld [vmem:[#allocation7] sm:$0xff]  ;;  %v255_v9 = vld [vmem:[#allocation6] ss:$0 sm:$0xff]  ;;  %v185_v14 = vld [vmem:[#allocation9 + $0x10] sm:$0xff] }
  0x1e   :  { %v186_v13 = vld [vmem:[#allocation9 + $0x18] sm:$0xff]  ;;  %v184_v15 = vld [vmem:[#allocation9 + $0x8] sm:$0xff]  ;;  %v183_v16 = vld [vmem:[#allocation9] sm:$0xff] }
  0x1f   :  { %144 = vmatpush.msra.mxu0 %v119_v2  ;;  %175 = vmatpush.msra.mxu1 %v153_v6  ;;  %v256_v17 = vld [vmem:[%s522_s4] ss:$0 sm:$0xff]  ;;  %s424_s4 = smov 112   ;;  %v214_v27 = vld [vmem:[#allocation10] sm:$0xff] }
  0x20   :  { %206 = vmatpush.msra.mxu2 %v186_v13  ;;  %v257_v21 = vld [vmem:[%s524_s6] ss:$0 sm:$0xff] }
  0x21   :  { %145 = vmatpush.msra.mxu0 %v118_v3  ;;  %176 = vmatpush.msra.mxu1 %v152_v7 }
  0x22   :  { %241 = vmatmul.msk.f32.vlgmr.msra.gmra.mxu0 %vm126_vm0, %v117_v4  ;;  %207 = vmatpush.msra.mxu2 %v185_v14 }
  0x23   :  { %177 = vmatpush.msra.mxu1 %v151_v8 }
  0x24   :  { %208 = vmatpush.msra.mxu2 %v184_v15 }
  0x26   :  { %209 = vmatpush.msra.mxu2 %v183_v16 }
  0x9f   :  { %v147_v10 = vpop.f32.mrf.mxu0 }
  0xa0   :  { %v148_v11 = vadd.f32 %v255_v9, %v147_v10 }
  0xa2   :  { %258 = vtanh.f32 %v148_v11 }
  0xa8   :  { %v259_v12 = vpop.eup %258 }
  0xa9   :  { %242 = vmatmul.msk.f32.vlgmr.msra.gmra.mxu1 %vm126_vm0, %v259_v12 }
 0x126   :  { %v179_v18 = vpop.f32.mrf.mxu1 }
 0x127   :  { %v180_v19 = vadd.f32 %v256_v17, %v179_v18 }
 0x129   :  { %260 = vtanh.f32 %v180_v19 }
 0x12f   :  { %v261_v20 = vpop.eup %260 }
 0x130   :  { %243 = vmatmul.msk.f32.vlgmr.msra.gmra.mxu2 %vm126_vm0, %v261_v20 }
 0x1b3   :  { %v211_v22 = vpop.f32.mrf.mxu2 }
 0x1b4   :  { %v212_v23 = vadd.f32 %v257_v21, %v211_v22 }
 0x1b6   :  { %v215_v24 = vmul.f32 0.5, %v212_v23  ;;  %224 = vst.msk [vmem:[%s526_s8] sm:$0xff] %vm126_vm0, %v212_v23 }
 0x1b8   :  { %v216_v25 = vmul.f32 1.442695, %v215_v24 }
 0x1ba   :  { %262 = vpow2.f32 %v216_v25 }
 0x1c0   :  { %v263_v26 = vpop.eup %262 }
 0x1c1   :  { %219 = vrot.lane.b32.xlu0 %v263_v26, %s424_s4 }
 0x233   :  { %v220_v28 = vpop.permute.xlu0 %219 }
 0x234   :  { %v222_v29 = vmul.f32 %v220_v28, %v214_v27 }
 0x236   :  { %v223_v30 = vadd.f32 %v222_v29, %v212_v23 }
 0x238   :  { %226 = vrot.lane.b32.xlu0 %v223_v30, %s425_s15 }
 0x2aa   :  { %v227_v31 = vpop.permute.xlu0 %226 }
 0x2ab   :  { %230 = vst.msk [vmem:[%s526_s8] sm:$0xff] %vm229_vm1, %v227_v31 }
 0x2ac   :  { %232 = vst.msk [vmem:[%s526_s8] sm:$0xff] %vm231_vm2, %v426_v32 }
 0x2ad   :  { %237 = vsyncpa [#allocation3], 1 }
 0x2ae   :  { %238 = vsyncpa [#allocation5], 1 }
 0x2af   :  { %239 = vsyncpa [#allocation8], 1 }
 0x2b0   :  { %240 = vsyncpa [#allocation11], 1 }

</bundles_post_ra>
